<compile_context>
chip_gen: v7x
topology: tpu7x:2x2x1
jax: 0.10.0
libtpu: 0.0.40
codegen_flags: <defaults>
</compile_context>

<pallas_src>
import functools

import jax
import jax.numpy as jnp
from jax.experimental import pallas as pl
from jax.experimental.pallas import tpu as pltpu

_ALIGN = 16      # sublane alignment: native (16, 128) bf16 tile
_LANES = 128


def _round_up(x, m):
    return (x + m - 1) // m * m


def _vmem_capacity_bytes():
    """Physical VMEM of the local TPU generation; conservative fallback (v7x per-TC)."""
    try:
        return int(pltpu.get_tpu_info().vmem_capacity_bytes)
    except Exception:
        return 64 << 20


def _pick_tile_rows(n_rows, hidden, out_w, vmem_budget):
    """Largest 16-aligned token tile that (a) fits the VMEM budget with double-buffered
    activations + f32 intermediates + resident weights and (b) leaves >= 2 grid steps
    so both TensorCores on v7x get work."""
    resident = (hidden * hidden * 2            # w_enc bf16 (single copy)
                + hidden * out_w * 2           # fused head weight bf16
                + 4 * hidden * 4 + out_w * 4)  # biases / LN params f32
    per_row = (2 * hidden * 2                  # emb tile, double-buffered bf16
               + 2 * out_w * 2                 # out tile, double-buffered bf16
               + 4 * hidden * 4)               # f32 intermediates (h / GELU / LN)
    tm_cap = (vmem_budget - resident) // per_row
    tm_cap = max(_ALIGN, min(2048, tm_cap) // _ALIGN * _ALIGN)
    n_al = _round_up(max(n_rows, 1), _ALIGN)
    half = _round_up((n_al + 1) // 2, _ALIGN)  # guarantees >= 2 grid steps
    return min(tm_cap, half)


def _subj_kernel(emb_ref, w_enc_ref, b_enc_ref, gamma_ref, beta_ref,
                 w_heads_ref, b_heads_ref, out_ref):
    """Fused encoder layer + fused (start|end) subject-typing head.

    emb_ref     : [TM, H]      token embeddings (bf16), one tile of tokens
    w_enc_ref   : [H, H]       synthetic encoder dense weight (bf16)
    b_enc_ref   : [1, H]       f32
    gamma/beta  : [1, H]       LayerNorm params (f32)
    w_heads_ref : [H, OUT_W]   [w_start | w_end | zero-pad] (bf16), OUT_W 128-aligned
    b_heads_ref : [1, OUT_W]   f32
    out_ref     : [TM, OUT_W]  lane-dense fused logits (bf16); wrapper slices + upcasts
    """
    x = emb_ref[...]  # bf16

    # --- synthetic "based_encoder": dense -> GELU -> LayerNorm -------------
    h = jnp.dot(x, w_enc_ref[...], preferred_element_type=jnp.float32)
    h = h + b_enc_ref[...]
    # tanh GELU: transcendental lands on the EUP slot (effectively free) instead of an
    # erf polynomial saturating the VPU; this is also the GELU BERT itself uses.
    h = jax.nn.gelu(h, approximate=True)

    mu = jnp.mean(h, axis=-1, keepdims=True)
    var = jnp.mean(h * h, axis=-1, keepdims=True) - mu * mu   # one-pass variance
    var = jnp.maximum(var, 0.0)                               # guard f32 cancellation
    h = (h - mu) * jax.lax.rsqrt(var + 1e-12)                 # eps=1e-12 (BERT LayerNorm)
    h = h * gamma_ref[...] + beta_ref[...]

    # --- SubjTypeModel: dropout (eval = identity) + fused linear heads -----
    logits = jnp.dot(h.astype(jnp.bfloat16), w_heads_ref[...],
                     preferred_element_type=jnp.float32) + b_heads_ref[...]
    out_ref[...] = logits.astype(out_ref.dtype)               # bf16 store: halved writeback


def prepare_params(params):
    """One-time host-side weight prep (outside the per-call jit): bf16 casts,
    head fusion and lane padding are NOT re-done every forward."""
    H, C = params["w_start"].shape
    out_w = _round_up(2 * C, _LANES)
    w_heads = jnp.concatenate([params["w_start"], params["w_end"]], axis=1)
    w_heads = jnp.pad(w_heads, ((0, 0), (0, out_w - 2 * C))).astype(jnp.bfloat16)
    b_heads = jnp.concatenate([params["b_start"], params["b_end"]], axis=1)
    b_heads = jnp.pad(b_heads, ((0, 0), (0, out_w - 2 * C))).astype(jnp.float32)
    return {
        "embedding": params["embedding"].astype(jnp.bfloat16),  # halves gather table reads
        "w_enc": params["w_enc"].astype(jnp.bfloat16),
        "b_enc": params["b_enc"].astype(jnp.float32),
        "gamma": params["gamma"].astype(jnp.float32),
        "beta": params["beta"].astype(jnp.float32),
        "w_heads": w_heads,
        "b_heads": b_heads,
    }


@functools.partial(jax.jit, static_argnames=("num_classes", "single_buffer_weights"))
def bilstm_cnn_forward(words, prepped, *, num_classes, single_buffer_weights=True):
    """words: int32 [B, T] token ids.  Returns (start_logits, end_logits) as f32 [B, T, C]."""
    B, T = words.shape
    H = prepped["embedding"].shape[1]
    out_w = prepped["w_heads"].shape[1]
    C = num_classes
    N = B * T

    # Glue: embedding lookup (gather) on the pre-cast bf16 table.
    emb = jnp.take(prepped["embedding"], words.reshape(-1), axis=0)

    # Generation-aware tiling: TM sized against queried VMEM, >= 2 even grid steps.
    vmem_budget = _vmem_capacity_bytes() // 2        # headroom for compiler scratch
    TM = _pick_tile_rows(N, H, out_w, vmem_budget)
    N_pad = _round_up(N, 2 * TM)                     # even grid -> balanced megacore split
    if N_pad != N:
        emb = jnp.pad(emb, ((0, N_pad - N), (0, 0)))
    grid = (N_pad // TM,)

    if single_buffer_weights:
        # Constant-index operands don't need double-buffering -> free the extra copy.
        const_spec = lambda shape: pl.BlockSpec(shape, lambda i: (0, 0),
                                                pipeline_mode=pl.Buffered(1))
    else:
        const_spec = lambda shape: pl.BlockSpec(shape, lambda i: (0, 0))

    fused = pl.pallas_call(
        _subj_kernel,
        out_shape=jax.ShapeDtypeStruct((N_pad, out_w), jnp.bfloat16),
        grid=grid,
        in_specs=[
            pl.BlockSpec((TM, H), lambda i: (i, 0)),   # emb tile, pipelined over N
            const_spec((H, H)),                        # w_enc (VMEM-resident)
            const_spec((1, H)),                        # b_enc
            const_spec((1, H)),                        # gamma
            const_spec((1, H)),                        # beta
            const_spec((H, out_w)),                    # fused head weight
            const_spec((1, out_w)),                    # fused head bias
        ],
        out_specs=pl.BlockSpec((TM, out_w), lambda i: (i, 0)),
        compiler_params=pltpu.CompilerParams(
            dimension_semantics=("parallel",),         # megacore sharding on v7x
            vmem_limit_bytes=int(vmem_budget),         # allow large tiles on v5e/v6e
        ),
    )(
        emb, prepped["w_enc"], prepped["b_enc"], prepped["gamma"],
        prepped["beta"], prepped["w_heads"], prepped["b_heads"],
    )

    fused = fused[:N].astype(jnp.float32)
    # .squeeze(-1) in the torch code is a no-op for num_classes > 1.
    start = fused[:, :C].reshape(B, T, C)
    end = fused[:, C:2 * C].reshape(B, T, C)
    return start, end


def make_params(key, vocab, hidden, num_classes):
    ks = jax.random.split(key, 6)
    xavier = lambda k, shp: jax.random.uniform(
        k, shp, jnp.float32,
        -jnp.sqrt(6.0 / (shp[0] + shp[1])), jnp.sqrt(6.0 / (shp[0] + shp[1])))
    return {
        "embedding": jax.random.normal(ks[0], (vocab, hidden), jnp.float32) * 0.02,
        "w_enc": xavier(ks[1], (hidden, hidden)),
        "b_enc": jnp.zeros((1, hidden), jnp.float32),
        "gamma": jnp.ones((1, hidden), jnp.float32),
        "beta": jnp.zeros((1, hidden), jnp.float32),
        # nn.Linear(H, C): store as [H, C] (weight.T) so the kernel does h @ W.
        "w_start": xavier(ks[2], (hidden, num_classes)),
        "b_start": jnp.zeros((1, num_classes), jnp.float32),
        "w_end": xavier(ks[3], (hidden, num_classes)),
        "b_end": jnp.zeros((1, num_classes), jnp.float32),
    }


if __name__ == "__main__":
    B, T = 2, 8            # batch, sequence length
    H = 128                # word_emb_dim / hidden (lane-aligned)
    VOCAB = 64
    NUM_SUBJ_TYPE = 7      # num_subj_type + 1 = 8 output classes
    C = NUM_SUBJ_TYPE + 1

    key = jax.random.PRNGKey(0)
    kw, kp = jax.random.split(key)
    words = jax.random.randint(kw, (B, T), 0, VOCAB, dtype=jnp.int32)
    params = make_params(kp, VOCAB, H, C)
    prepped = prepare_params(params)   # one-time weight prep, outside the jitted forward

    def _run(single_buffer):
        out = bilstm_cnn_forward(words, prepped, num_classes=C,
                                 single_buffer_weights=single_buffer)
        jax.block_until_ready(out)
        return out

    try:
        start_logits, end_logits = _run(True)
    except Exception:
        # Fallback if this jax version rejects pipeline_mode=pl.Buffered(1):
        # identical kernel with default double-buffered constant operands.
        start_logits, end_logits = _run(False)

    assert start_logits.shape == (B, T, C) and end_logits.shape == (B, T, C)
    assert start_logits.dtype == jnp.float32 and end_logits.dtype == jnp.float32
    print("KERNEL_OK")
</pallas_src>

<mosaic_0001>
module attributes {stable_mosaic.version = 11 : i64} {
  func.func @_subj_kernel(%arg0: i32, %arg1: memref<16x128xbf16, #tpu.memory_space<vmem>>, %arg2: memref<128x128xbf16, #tpu.memory_space<vmem>>, %arg3: memref<1x128xf32, #tpu.memory_space<vmem>>, %arg4: memref<1x128xf32, #tpu.memory_space<vmem>>, %arg5: memref<1x128xf32, #tpu.memory_space<vmem>>, %arg6: memref<128x128xbf16, #tpu.memory_space<vmem>>, %arg7: memref<1x128xf32, #tpu.memory_space<vmem>>, %arg8: memref<16x128xbf16, #tpu.memory_space<vmem>>) attributes {dimension_semantics = [#tpu.dimension_semantics<parallel>], iteration_bounds = array<i64: 2>, scalar_prefetch = 0 : i64, scratch_operands = 0 : i64, tpu.core_type = #tpu.core_type<tc>, window_params = [{transform_indices = @transform_0, window_bounds = array<i64: 16, 128>}, {pipeline_mode = #tpu.pipeline_mode<synchronous>, transform_indices = @transform_1, window_bounds = array<i64: 128, 128>}, {pipeline_mode = #tpu.pipeline_mode<synchronous>, transform_indices = @transform_2, window_bounds = array<i64: 1, 128>}, {pipeline_mode = #tpu.pipeline_mode<synchronous>, transform_indices = @transform_3, window_bounds = array<i64: 1, 128>}, {pipeline_mode = #tpu.pipeline_mode<synchronous>, transform_indices = @transform_4, window_bounds = array<i64: 1, 128>}, {pipeline_mode = #tpu.pipeline_mode<synchronous>, transform_indices = @transform_5, window_bounds = array<i64: 128, 128>}, {pipeline_mode = #tpu.pipeline_mode<synchronous>, transform_indices = @transform_6, window_bounds = array<i64: 1, 128>}, {transform_indices = @transform_7, window_bounds = array<i64: 16, 128>}]} {
    %c0 = arith.constant 0 : index
    %c0_0 = arith.constant 0 : index
    %0 = vector.load %arg1[%c0, %c0_0] : memref<16x128xbf16, #tpu.memory_space<vmem>>, vector<16x128xbf16>
    %c0_1 = arith.constant 0 : index
    %c0_2 = arith.constant 0 : index
    %1 = vector.load %arg2[%c0_1, %c0_2] : memref<128x128xbf16, #tpu.memory_space<vmem>>, vector<128x128xbf16>
    %cst = arith.constant dense<0.000000e+00> : vector<16x128xf32>
    %2 = tpu.matmul %0, %1, %cst {dimension_numbers = #tpu.dot_dimension_numbers<[1], [0], [0], [1], [0, 0, 1, 1], [], []>} : vector<16x128xbf16>, vector<128x128xbf16>, vector<16x128xf32> -> vector<16x128xf32>
    %c0_3 = arith.constant 0 : index
    %c0_4 = arith.constant 0 : index
    %3 = vector.load %arg3[%c0_3, %c0_4] : memref<1x128xf32, #tpu.memory_space<vmem>>, vector<1x128xf32>
    %4 = vector.broadcast %3 : vector<1x128xf32> to vector<16x128xf32>
    %5 = arith.addf %2, %4 : vector<16x128xf32>
    %6 = arith.mulf %5, %5 : vector<16x128xf32>
    %7 = arith.mulf %5, %6 : vector<16x128xf32>
    %cst_5 = arith.constant 4.471500e-02 : f32
    %8 = vector.broadcast %cst_5 : f32 to vector<16x128xf32>
    %9 = arith.mulf %8, %7 : vector<16x128xf32>
    %10 = arith.addf %5, %9 : vector<16x128xf32>
    %cst_6 = arith.constant 0.797884583 : f32
    %11 = vector.broadcast %cst_6 : f32 to vector<16x128xf32>
    %12 = arith.mulf %11, %10 : vector<16x128xf32>
    %13 = math.tanh %12 : vector<16x128xf32>
    %cst_7 = arith.constant 1.000000e+00 : f32
    %14 = vector.broadcast %cst_7 : f32 to vector<16x128xf32>
    %15 = arith.addf %14, %13 : vector<16x128xf32>
    %cst_8 = arith.constant 5.000000e-01 : f32
    %16 = vector.broadcast %cst_8 : f32 to vector<16x128xf32>
    %17 = arith.mulf %16, %15 : vector<16x128xf32>
    %18 = arith.mulf %5, %17 : vector<16x128xf32>
    %cst_9 = arith.constant dense<0.000000e+00> : vector<16xf32>
    %19 = vector.multi_reduction <add>, %18, %cst_9 [1] : vector<16x128xf32> to vector<16xf32>
    %20 = vector.shape_cast %19 : vector<16xf32> to vector<16x1xf32>
    %cst_10 = arith.constant 1.280000e+02 : f32
    %21 = vector.broadcast %cst_10 : f32 to vector<16x1xf32>
    %22 = arith.divf %20, %21 : vector<16x1xf32>
    %23 = arith.mulf %18, %18 : vector<16x128xf32>
    %cst_11 = arith.constant dense<0.000000e+00> : vector<16xf32>
    %24 = vector.multi_reduction <add>, %23, %cst_11 [1] : vector<16x128xf32> to vector<16xf32>
    %25 = vector.shape_cast %24 : vector<16xf32> to vector<16x1xf32>
    %cst_12 = arith.constant 1.280000e+02 : f32
    %26 = vector.broadcast %cst_12 : f32 to vector<16x1xf32>
    %27 = arith.divf %25, %26 : vector<16x1xf32>
    %28 = arith.mulf %22, %22 : vector<16x1xf32>
    %29 = arith.subf %27, %28 : vector<16x1xf32>
    %cst_13 = arith.constant 0.000000e+00 : f32
    %30 = vector.broadcast %cst_13 : f32 to vector<16x1xf32>
    %31 = arith.maximumf %29, %30 : vector<16x1xf32>
    %32 = vector.broadcast %22 : vector<16x1xf32> to vector<16x128xf32>
    %33 = arith.subf %18, %32 : vector<16x128xf32>
    %cst_14 = arith.constant 9.99999996E-13 : f32
    %34 = vector.broadcast %cst_14 : f32 to vector<16x1xf32>
    %35 = arith.addf %31, %34 : vector<16x1xf32>
    %36 = math.rsqrt %35 : vector<16x1xf32>
    %37 = vector.broadcast %36 : vector<16x1xf32> to vector<16x128xf32>
    %38 = arith.mulf %33, %37 : vector<16x128xf32>
    %c0_15 = arith.constant 0 : index
    %c0_16 = arith.constant 0 : index
    %39 = vector.load %arg4[%c0_15, %c0_16] : memref<1x128xf32, #tpu.memory_space<vmem>>, vector<1x128xf32>
    %40 = vector.broadcast %39 : vector<1x128xf32> to vector<16x128xf32>
    %41 = arith.mulf %38, %40 : vector<16x128xf32>
    %c0_17 = arith.constant 0 : index
    %c0_18 = arith.constant 0 : index
    %42 = vector.load %arg5[%c0_17, %c0_18] : memref<1x128xf32, #tpu.memory_space<vmem>>, vector<1x128xf32>
    %43 = vector.broadcast %42 : vector<1x128xf32> to vector<16x128xf32>
    %44 = arith.addf %41, %43 : vector<16x128xf32>
    %45 = arith.truncf %44 : vector<16x128xf32> to vector<16x128xbf16>
    %c0_19 = arith.constant 0 : index
    %c0_20 = arith.constant 0 : index
    %46 = vector.load %arg6[%c0_19, %c0_20] : memref<128x128xbf16, #tpu.memory_space<vmem>>, vector<128x128xbf16>
    %cst_21 = arith.constant dense<0.000000e+00> : vector<16x128xf32>
    %47 = tpu.matmul %45, %46, %cst_21 {dimension_numbers = #tpu.dot_dimension_numbers<[1], [0], [0], [1], [0, 0, 1, 1], [], []>} : vector<16x128xbf16>, vector<128x128xbf16>, vector<16x128xf32> -> vector<16x128xf32>
    %c0_22 = arith.constant 0 : index
    %c0_23 = arith.constant 0 : index
    %48 = vector.load %arg7[%c0_22, %c0_23] : memref<1x128xf32, #tpu.memory_space<vmem>>, vector<1x128xf32>
    %49 = vector.broadcast %48 : vector<1x128xf32> to vector<16x128xf32>
    %50 = arith.addf %47, %49 : vector<16x128xf32>
    %51 = arith.truncf %50 : vector<16x128xf32> to vector<16x128xbf16>
    %c0_24 = arith.constant 0 : index
    %c0_25 = arith.constant 0 : index
    %52 = vector.load %arg8[%c0_24, %c0_25] : memref<16x128xbf16, #tpu.memory_space<vmem>>, vector<16x128xbf16>
    tpu.vector_store %arg8[%c0_24, %c0_25], %51 {strides = array<i32>} : memref<16x128xbf16, #tpu.memory_space<vmem>>, vector<16x128xbf16>,
    return
  }
  func.func @transform_0(%arg0: i32) -> (i32, i32) {
    %c0_i32 = arith.constant 0 : i32
    %c0_i32_0 = arith.constant 0 : i32
    return %arg0, %c0_i32 : i32, i32
  }
  func.func @transform_1(%arg0: i32) -> (i32, i32) {
    %c0_i32 = arith.constant 0 : i32
    %c0_i32_0 = arith.constant 0 : i32
    %c0_i32_1 = arith.constant 0 : i32
    return %c0_i32, %c0_i32_0 : i32, i32
  }
  func.func @transform_2(%arg0: i32) -> (i32, i32) {
    %c0_i32 = arith.constant 0 : i32
    %c0_i32_0 = arith.constant 0 : i32
    %c0_i32_1 = arith.constant 0 : i32
    return %c0_i32, %c0_i32_0 : i32, i32
  }
  func.func @transform_3(%arg0: i32) -> (i32, i32) {
    %c0_i32 = arith.constant 0 : i32
    %c0_i32_0 = arith.constant 0 : i32
    %c0_i32_1 = arith.constant 0 : i32
    return %c0_i32, %c0_i32_0 : i32, i32
  }
  func.func @transform_4(%arg0: i32) -> (i32, i32) {
    %c0_i32 = arith.constant 0 : i32
    %c0_i32_0 = arith.constant 0 : i32
    %c0_i32_1 = arith.constant 0 : i32
    return %c0_i32, %c0_i32_0 : i32, i32
  }
  func.func @transform_5(%arg0: i32) -> (i32, i32) {
    %c0_i32 = arith.constant 0 : i32
    %c0_i32_0 = arith.constant 0 : i32
    %c0_i32_1 = arith.constant 0 : i32
    return %c0_i32, %c0_i32_0 : i32, i32
  }
  func.func @transform_6(%arg0: i32) -> (i32, i32) {
    %c0_i32 = arith.constant 0 : i32
    %c0_i32_0 = arith.constant 0 : i32
    %c0_i32_1 = arith.constant 0 : i32
    return %c0_i32, %c0_i32_0 : i32, i32
  }
  func.func @transform_7(%arg0: i32) -> (i32, i32) {
    %c0_i32 = arith.constant 0 : i32
    %c0_i32_0 = arith.constant 0 : i32
    return %arg0, %c0_i32 : i32, i32
  }
}

module attributes {stable_mosaic.version = 11 : i64} {
  func.func @_subj_kernel(%arg0: i32, %arg1: memref<16x128xbf16, #tpu.memory_space<vmem>>, %arg2: memref<128x128xbf16, #tpu.memory_space<vmem>>, %arg3: memref<1x128xf32, #tpu.memory_space<vmem>>, %arg4: memref<1x128xf32, #tpu.memory_space<vmem>>, %arg5: memref<1x128xf32, #tpu.memory_space<vmem>>, %arg6: memref<128x128xbf16, #tpu.memory_space<vmem>>, %arg7: memref<1x128xf32, #tpu.memory_space<vmem>>, %arg8: memref<16x128xbf16, #tpu.memory_space<vmem>>) attributes {dimension_semantics = [#tpu.dimension_semantics<parallel>], iteration_bounds = array<i64: 2>, scalar_prefetch = 0 : i64, scratch_operands = 0 : i64, tpu.core_type = #tpu.core_type<tc>, window_params = [{transform_indices = @transform_0, window_bounds = array<i64: 16, 128>}, {pipeline_mode = #tpu.pipeline_mode<synchronous>, transform_indices = @transform_1, window_bounds = array<i64: 128, 128>}, {pipeline_mode = #tpu.pipeline_mode<synchronous>, transform_indices = @transform_2, window_bounds = array<i64: 1, 128>}, {pipeline_mode = #tpu.pipeline_mode<synchronous>, transform_indices = @transform_3, window_bounds = array<i64: 1, 128>}, {pipeline_mode = #tpu.pipeline_mode<synchronous>, transform_indices = @transform_4, window_bounds = array<i64: 1, 128>}, {pipeline_mode = #tpu.pipeline_mode<synchronous>, transform_indices = @transform_5, window_bounds = array<i64: 128, 128>}, {pipeline_mode = #tpu.pipeline_mode<synchronous>, transform_indices = @transform_6, window_bounds = array<i64: 1, 128>}, {transform_indices = @transform_7, window_bounds = array<i64: 16, 128>}]} {
    %c0 = arith.constant 0 : index
    %c0_0 = arith.constant 0 : index
    %0 = vector.load %arg1[%c0, %c0_0] : memref<16x128xbf16, #tpu.memory_space<vmem>>, vector<16x128xbf16>
    %c0_1 = arith.constant 0 : index
    %c0_2 = arith.constant 0 : index
    %1 = vector.load %arg2[%c0_1, %c0_2] : memref<128x128xbf16, #tpu.memory_space<vmem>>, vector<128x128xbf16>
    %cst = arith.constant dense<0.000000e+00> : vector<16x128xf32>
    %2 = tpu.matmul %0, %1, %cst {dimension_numbers = #tpu.dot_dimension_numbers<[1], [0], [0], [1], [0, 0, 1, 1], [], []>} : vector<16x128xbf16>, vector<128x128xbf16>, vector<16x128xf32> -> vector<16x128xf32>
    %c0_3 = arith.constant 0 : index
    %c0_4 = arith.constant 0 : index
    %3 = vector.load %arg3[%c0_3, %c0_4] : memref<1x128xf32, #tpu.memory_space<vmem>>, vector<1x128xf32>
    %4 = vector.broadcast %3 : vector<1x128xf32> to vector<16x128xf32>
    %5 = arith.addf %2, %4 : vector<16x128xf32>
    %6 = arith.mulf %5, %5 : vector<16x128xf32>
    %7 = arith.mulf %5, %6 : vector<16x128xf32>
    %cst_5 = arith.constant 4.471500e-02 : f32
    %8 = vector.broadcast %cst_5 : f32 to vector<16x128xf32>
    %9 = arith.mulf %8, %7 : vector<16x128xf32>
    %10 = arith.addf %5, %9 : vector<16x128xf32>
    %cst_6 = arith.constant 0.797884583 : f32
    %11 = vector.broadcast %cst_6 : f32 to vector<16x128xf32>
    %12 = arith.mulf %11, %10 : vector<16x128xf32>
    %13 = math.tanh %12 : vector<16x128xf32>
    %cst_7 = arith.constant 1.000000e+00 : f32
    %14 = vector.broadcast %cst_7 : f32 to vector<16x128xf32>
    %15 = arith.addf %14, %13 : vector<16x128xf32>
    %cst_8 = arith.constant 5.000000e-01 : f32
    %16 = vector.broadcast %cst_8 : f32 to vector<16x128xf32>
    %17 = arith.mulf %16, %15 : vector<16x128xf32>
    %18 = arith.mulf %5, %17 : vector<16x128xf32>
    %cst_9 = arith.constant dense<0.000000e+00> : vector<16xf32>
    %19 = vector.multi_reduction <add>, %18, %cst_9 [1] : vector<16x128xf32> to vector<16xf32>
    %20 = vector.shape_cast %19 : vector<16xf32> to vector<16x1xf32>
    %cst_10 = arith.constant 1.280000e+02 : f32
    %21 = vector.broadcast %cst_10 : f32 to vector<16x1xf32>
    %22 = arith.divf %20, %21 : vector<16x1xf32>
    %23 = arith.mulf %18, %18 : vector<16x128xf32>
    %cst_11 = arith.constant dense<0.000000e+00> : vector<16xf32>
    %24 = vector.multi_reduction <add>, %23, %cst_11 [1] : vector<16x128xf32> to vector<16xf32>
    %25 = vector.shape_cast %24 : vector<16xf32> to vector<16x1xf32>
    %cst_12 = arith.constant 1.280000e+02 : f32
    %26 = vector.broadcast %cst_12 : f32 to vector<16x1xf32>
    %27 = arith.divf %25, %26 : vector<16x1xf32>
    %28 = arith.mulf %22, %22 : vector<16x1xf32>
    %29 = arith.subf %27, %28 : vector<16x1xf32>
    %cst_13 = arith.constant 0.000000e+00 : f32
    %30 = vector.broadcast %cst_13 : f32 to vector<16x1xf32>
    %31 = arith.maximumf %29, %30 : vector<16x1xf32>
    %32 = vector.broadcast %22 : vector<16x1xf32> to vector<16x128xf32>
    %33 = arith.subf %18, %32 : vector<16x128xf32>
    %cst_14 = arith.constant 9.99999996E-13 : f32
    %34 = vector.broadcast %cst_14 : f32 to vector<16x1xf32>
    %35 = arith.addf %31, %34 : vector<16x1xf32>
    %36 = math.rsqrt %35 : vector<16x1xf32>
    %37 = vector.broadcast %36 : vector<16x1xf32> to vector<16x128xf32>
    %38 = arith.mulf %33, %37 : vector<16x128xf32>
    %c0_15 = arith.constant 0 : index
    %c0_16 = arith.constant 0 : index
    %39 = vector.load %arg4[%c0_15, %c0_16] : memref<1x128xf32, #tpu.memory_space<vmem>>, vector<1x128xf32>
    %40 = vector.broadcast %39 : vector<1x128xf32> to vector<16x128xf32>
    %41 = arith.mulf %38, %40 : vector<16x128xf32>
    %c0_17 = arith.constant 0 : index
    %c0_18 = arith.constant 0 : index
    %42 = vector.load %arg5[%c0_17, %c0_18] : memref<1x128xf32, #tpu.memory_space<vmem>>, vector<1x128xf32>
    %43 = vector.broadcast %42 : vector<1x128xf32> to vector<16x128xf32>
    %44 = arith.addf %41, %43 : vector<16x128xf32>
    %45 = arith.truncf %44 : vector<16x128xf32> to vector<16x128xbf16>
    %c0_19 = arith.constant 0 : index
    %c0_20 = arith.constant 0 : index
    %46 = vector.load %arg6[%c0_19, %c0_20] : memref<128x128xbf16, #tpu.memory_space<vmem>>, vector<128x128xbf16>
    %cst_21 = arith.constant dense<0.000000e+00> : vector<16x128xf32>
    %47 = tpu.matmul %45, %46, %cst_21 {dimension_numbers = #tpu.dot_dimension_numbers<[1], [0], [0], [1], [0, 0, 1, 1], [], []>} : vector<16x128xbf16>, vector<128x128xbf16>, vector<16x128xf32> -> vector<16x128xf32>
    %c0_22 = arith.constant 0 : index
    %c0_23 = arith.constant 0 : index
    %48 = vector.load %arg7[%c0_22, %c0_23] : memref<1x128xf32, #tpu.memory_space<vmem>>, vector<1x128xf32>
    %49 = vector.broadcast %48 : vector<1x128xf32> to vector<16x128xf32>
    %50 = arith.addf %47, %49 : vector<16x128xf32>
    %51 = arith.truncf %50 : vector<16x128xf32> to vector<16x128xbf16>
    %c0_24 = arith.constant 0 : index
    %c0_25 = arith.constant 0 : index
    %52 = vector.load %arg8[%c0_24, %c0_25] : memref<16x128xbf16, #tpu.memory_space<vmem>>, vector<16x128xbf16>
    tpu.vector_store %arg8[%c0_24, %c0_25], %51 {strides = array<i32>} : memref<16x128xbf16, #tpu.memory_space<vmem>>, vector<16x128xbf16>,
    return
  }
  func.func @transform_0(%arg0: i32) -> (i32, i32) {
    %c0_i32 = arith.constant 0 : i32
    %c0_i32_0 = arith.constant 0 : i32
    return %arg0, %c0_i32 : i32, i32
  }
  func.func @transform_1(%arg0: i32) -> (i32, i32) {
    %c0_i32 = arith.constant 0 : i32
    %c0_i32_0 = arith.constant 0 : i32
    %c0_i32_1 = arith.constant 0 : i32
    return %c0_i32, %c0_i32_0 : i32, i32
  }
  func.func @transform_2(%arg0: i32) -> (i32, i32) {
    %c0_i32 = arith.constant 0 : i32
    %c0_i32_0 = arith.constant 0 : i32
    %c0_i32_1 = arith.constant 0 : i32
    return %c0_i32, %c0_i32_0 : i32, i32
  }
  func.func @transform_3(%arg0: i32) -> (i32, i32) {
    %c0_i32 = arith.constant 0 : i32
    %c0_i32_0 = arith.constant 0 : i32
    %c0_i32_1 = arith.constant 0 : i32
    return %c0_i32, %c0_i32_0 : i32, i32
  }
  func.func @transform_4(%arg0: i32) -> (i32, i32) {
    %c0_i32 = arith.constant 0 : i32
    %c0_i32_0 = arith.constant 0 : i32
    %c0_i32_1 = arith.constant 0 : i32
    return %c0_i32, %c0_i32_0 : i32, i32
  }
  func.func @transform_5(%arg0: i32) -> (i32, i32) {
    %c0_i32 = arith.constant 0 : i32
    %c0_i32_0 = arith.constant 0 : i32
    %c0_i32_1 = arith.constant 0 : i32
    return %c0_i32, %c0_i32_0 : i32, i32
  }
  func.func @transform_6(%arg0: i32) -> (i32, i32) {
    %c0_i32 = arith.constant 0 : i32
    %c0_i32_0 = arith.constant 0 : i32
    %c0_i32_1 = arith.constant 0 : i32
    return %c0_i32, %c0_i32_0 : i32, i32
  }
  func.func @transform_7(%arg0: i32) -> (i32, i32) {
    %c0_i32 = arith.constant 0 : i32
    %c0_i32_0 = arith.constant 0 : i32
    return %arg0, %c0_i32 : i32, i32
  }
}

</mosaic_0001>

<bundles_post_ra>
// kernel: bilstm_cnn_forward.1
= control target key start
LH: loop header
LB: loop body
LE: loop exit
PB: predicated region body
PF: predicated region fallthrough
CT: control target
= control target key end

     0   :  { %s831_s24 = smov 0   ;;  %s933_s0 = inlined_call_operand.vmem [shape: bf16[32,128], index: 0, kind: input, shape index: {}]   ;;  %s934_s1 = inlined_call_operand.vmem [shape: bf16[128,128], index: 1, kind: input, shape index: {}]   ;;  %s935_s2 = inlined_call_operand.vmem [shape: f32[1,128], index: 2, kind: input, shape index: {}]   ;;  %s936_s3 = inlined_call_operand.vmem [shape: f32[1,128], index: 3, kind: input, shape index: {}]   ;;  %s937_s4 = inlined_call_operand.vmem [shape: f32[1,128], index: 4, kind: input, shape index: {}]   ;;  %s938_s5 = inlined_call_operand.vmem [shape: bf16[128,128], index: 5, kind: input, shape index: {}]   ;;  %s939_s6 = inlined_call_operand.vmem [shape: f32[1,128], index: 6, kind: input, shape index: {}]   ;;  %s940_s7 = inlined_call_operand.vmem [shape: bf16[32,128], index: 7, kind: output, shape index: {}]  }
   0x1 LB: > { %s647_s25 = sadd.s32 4294967295, %s787_s24   ;;  %p651_p0 = scmp.ge.s32.totalorder %s787_s24, 1  ;;  %s787_s24 = sphi %s831_s24, %s17_s24  }
   0x2   : > { %p238_p1 = scmp.lt.s32.totalorder %s787_s24, 3 }
   0x4   : > { %p239_p2 = pnand %p651_p0, %p238_p1 }
   0x5   : > { %v756_v0 = vld [vmem:[%s934_s1] sm:$0xff] (!%p239_p2)   ;;  %v789_v1 = vmov (!%p239_p2), 0.0   ;;  %v757_v2 = vld [vmem:[%s934_s1 + $0x8] sm:$0xff] (!%p239_p2)   ;;  %vm790_vm0 = vmmov (!%p239_p2), 0   ;;  %s652_s30 = sshll.u32 (!%p239_p2), %s647_s25, 1  ;;  %v758_v3 = vld [vmem:[%s934_s1 + $0x10] sm:$0xff] (!%p239_p2)  }
   0x6   : > { %242 = sbr.rel (%p239_p2) target bundleno = 673 (0x2a1), region = 48  ;;  %706 = vmatprep.subr.bf16.mxu0 (!%p239_p2), %v789_v1  ;;  %726 = vmatprep.subr.bf16.mxu1 (!%p239_p2), %v789_v1  ;;  %p271_p3 = scmp.lt.s32.totalorder (!%p239_p2), %s652_s30, 3  ;;  %v759_v4 = vld [vmem:[%s934_s1 + $0x18] sm:$0xff] (!%p239_p2)   ;;  %v760_v5 = vld [vmem:[%s934_s1 + $0x20] sm:$0xff] (!%p239_p2)   ;;  %v761_v6 = vld [vmem:[%s934_s1 + $0x28] sm:$0xff] (!%p239_p2)  }
   0x7   : > { %707 = vmatpush3.bf16.msra.mxu0 (!%p239_p2), %v756_v0  ;;  %722 = vmatprep.mubr.msk.bf16.mxu0 (!%p239_p2), %vm790_vm0, %v789_v1  ;;  %v762_v7 = vld [vmem:[%s934_s1 + $0x30] sm:$0xff] (!%p239_p2)   ;;  %v763_v8 = vld [vmem:[%s934_s1 + $0x38] sm:$0xff] (!%p239_p2)   ;;  %v656_v10 = vld [vmem:[%s935_s2] ss:$0 sm:$0xff] (!%p239_p2) }
   0x8   : > { %708 = vmatprep.subr.bf16.mxu0 (!%p239_p2), %v789_v1  ;;  %742 = vmatprep.mubr.msk.bf16.mxu1 (!%p239_p2), %vm790_vm0, %v789_v1  ;;  %v765_v37 = vld [vmem:[%s938_s5] sm:$0xff] (!%p239_p2)   ;;  %v766_v38 = vld [vmem:[%s938_s5 + $0x8] sm:$0xff] (!%p239_p2)   ;;  %v767_v39 = vld [vmem:[%s938_s5 + $0x10] sm:$0xff] (!%p239_p2)  }
   0x9   : > { %727 = vmatpush3.bf16.msra.mxu1 (!%p239_p2), %v765_v37  ;;  %v768_v40 = vld [vmem:[%s938_s5 + $0x18] sm:$0xff] (!%p239_p2)   ;;  %v769_v41 = vld [vmem:[%s938_s5 + $0x20] sm:$0xff] (!%p239_p2)   ;;  %v770_v42 = vld [vmem:[%s938_s5 + $0x28] sm:$0xff] (!%p239_p2)  }
   0xa   : > { %728 = vmatprep.subr.bf16.mxu1 (!%p239_p2), %v789_v1  ;;  %v771_v43 = vld [vmem:[%s938_s5 + $0x30] sm:$0xff] (!%p239_p2)   ;;  %v772_v44 = vld [vmem:[%s938_s5 + $0x38] sm:$0xff] (!%p239_p2)   ;;  %v666_v0 = vld [vmem:[%s936_s3] ss:$0 sm:$0xff] (!%p239_p2) }
   0xb   : > { %709 = vmatpush3.bf16.msra.mxu0 (!%p239_p2), %v757_v2 }
   0xc   : > { %710 = vmatprep.subr.bf16.mxu0 (!%p239_p2), %v789_v1 }
   0xd   : > { %s942_s30 = smov (!%p271_p3, %s652_s30), 3  ;;  %729 = vmatpush3.bf16.msra.mxu1 %v766_v38 }
   0xe   : > { %s653_s10 = sshll.u32 %s942_s30, 2  ;;  %730 = vmatprep.subr.bf16.mxu1 %v789_v1 }
   0xf   : > { %s274_s13 = scalar_lea.vmem %s933_s0, %s653_s10  ;;  %711 = vmatpush3.bf16.msra.mxu0 %v758_v3  ;;  %s280_s9 = scalar_lea.vmem %s940_s7, %s653_s10 }
  0x10   : > { %712 = vmatprep.subr.bf16.mxu0 %v789_v1  ;;  %v764_v9 = vld [vmem:[%s274_s13] sm:$0xff]  }
  0x11   : > { %731 = vmatpush3.bf16.msra.mxu1 %v767_v39 }
  0x12   : > { %732 = vmatprep.subr.bf16.mxu1 %v789_v1 }
  0x13   : > { %713 = vmatpush3.bf16.msra.mxu0 %v759_v4 }
  0x14   : > { %714 = vmatprep.subr.bf16.mxu0 %v789_v1 }
  0x15   : > { %733 = vmatpush3.bf16.msra.mxu1 %v768_v40 }
  0x16   : > { %734 = vmatprep.subr.bf16.mxu1 %v789_v1 }
  0x17   : > { %715 = vmatpush3.bf16.msra.mxu0 %v760_v5  ;;  %v667_v5 = vld [vmem:[%s937_s4] ss:$0 sm:$0xff] }
  0x18   : > { %716 = vmatprep.subr.bf16.mxu0 %v789_v1 }
  0x19   : > { %735 = vmatpush3.bf16.msra.mxu1 %v769_v41 }
  0x1a   : > { %736 = vmatprep.subr.bf16.mxu1 %v789_v1 }
  0x1b   : > { %717 = vmatpush3.bf16.msra.mxu0 %v761_v6 }
  0x1c   : > { %718 = vmatprep.subr.bf16.mxu0 %v789_v1 }
  0x1d   : > { %737 = vmatpush3.bf16.msra.mxu1 %v770_v42 }
  0x1e   : > { %738 = vmatprep.subr.bf16.mxu1 %v789_v1 }
  0x1f   : > { %719 = vmatpush3.bf16.msra.mxu0 %v762_v7 }
  0x20   : > { %720 = vmatprep.subr.bf16.mxu0 %v789_v1 }
  0x21   : > { %739 = vmatpush3.bf16.msra.mxu1 %v771_v43 }
  0x22   : > { %740 = vmatprep.subr.bf16.mxu1 %v789_v1 }
  0x23   : > { %721 = vmatpush3.bf16.msra.mxu0 %v763_v8 }
  0x25   : > { %741 = vmatpush3.bf16.msra.mxu1 %v772_v44 }
  0x26   : > { %723 = vmatmul.mubr.bf16.vlgmr.msra.gmra.mrb[0].mxu0 %v764_v9 }
  0xf9   : > { %v396_v11 = vpop.f32.mrb[0].mxu0 }
  0xfa   : > { %v397_v12 = vadd.f32 %v656_v10, %v396_v11  ;;  %v724_v13 = vpop.f32.mrb[1].mxu0 }
  0xfb   : > { %v399_v14 = vpop.f32.mrb[2].mxu0 }
  0xfc   : > { %v403_v15 = vmul.f32 %v397_v12, %v397_v12  ;;  %v400_v16 = vadd.f32 %v656_v10, %v399_v14  ;;  %v725_v17 = vpop.f32.mrb[3].mxu0  ;;  %v668_v10 = vld [vmem:[%s939_s6] ss:$0 sm:$0xff] }
  0xfe   : > { %v405_v18 = vmul.f32 %v403_v15, %v397_v12  ;;  %v404_v19 = vmul.f32 %v400_v16, %v400_v16 }
 0x100   : > { %v407_v20 = vmul.f32 0.044715, %v405_v18  ;;  %v406_v21 = vmul.f32 %v404_v19, %v400_v16 }
 0x102   : > { %v409_v22 = vadd.f32 %v407_v20, %v397_v12  ;;  %v408_v23 = vmul.f32 0.044715, %v406_v21 }
 0x104   : > { %v411_v24 = vmul.f32 0.7978846, %v409_v22  ;;  %v410_v25 = vadd.f32 %v408_v23, %v400_v16 }
 0x106   : > { %v412_v26 = vmul.f32 0.7978846, %v410_v25  ;;  %773 = vtanh.f32 %v411_v24 }
 0x108   : > { %775 = vtanh.f32 %v412_v26 }
 0x110   : > { %v774_v27 = vpop.eup %773 }
 0x111   : > { %v415_v28 = vadd.f32 1.0, %v774_v27 }
 0x112   : > { %v776_v29 = vpop.eup %775 }
 0x113   : > { %v417_v30 = vmul.f32 0.5, %v415_v28  ;;  %v416_v31 = vadd.f32 1.0, %v776_v29 }
 0x115   : > { %v419_v32 = vmul.f32 %v417_v30, %v397_v12  ;;  %v418_v33 = vmul.f32 0.5, %v416_v31 }
 0x117   : > { %421 = vadd.xlane.f32.xlu0 %v419_v32  ;;  %v428_v34 = vmul.f32 %v419_v32, %v419_v32  ;;  %v420_v35 = vmul.f32 %v418_v33, %v400_v16 }
 0x119   : > { %430 = vadd.xlane.f32.xlu1 %v428_v34  ;;  %v429_v36 = vmul.f32 %v420_v35, %v420_v35 }
 0x11b   : > { %423 = vadd.xlane.f32.xlu0 %v420_v35 }
 0x11d   : > { %432 = vadd.xlane.f32.xlu1 %v429_v36 }
 0x1a4   : > { %v422_v45 = vpop.xlane.xlu0 %421 }
 0x1a5   : > { %v426_v46 = vmul.f32 0.0078125, %v422_v45 }
 0x1a6   : > { %v431_v47 = vpop.xlane.xlu1 %430 }
 0x1a7   : > { %v436_v48 = vmul.f32 %v426_v46, %v426_v46  ;;  %v434_v49 = vmul.f32 0.0078125, %v431_v47  ;;  %v442_v61 = vsub.f32 %v419_v32, %v426_v46 }
 0x1a8   : > { %v424_v50 = vpop.xlane.xlu0 %423 }
 0x1a9   : > { %v438_v51 = vsub.f32 %v434_v49, %v436_v48  ;;  %v427_v52 = vmul.f32 0.0078125, %v424_v50 }
 0x1aa   : > { %v433_v53 = vpop.xlane.xlu1 %432 }
 0x1ab   : > { %v440_v54 = vmax.f32 %v438_v51, 0.0  ;;  %v437_v55 = vmul.f32 %v427_v52, %v427_v52  ;;  %v435_v56 = vmul.f32 0.0078125, %v433_v53  ;;  %v443_v1 = vsub.f32 %v420_v35, %v427_v52 }
 0x1ad   : > { %v444_v57 = vadd.f32 1e-12, %v440_v54  ;;  %v439_v58 = vsub.f32 %v435_v56, %v437_v55 }
 0x1af   : > { %777 = vrsqrt.f32 %v444_v57  ;;  %v441_v59 = vmax.f32 %v439_v58, 0.0 }
 0x1b1   : > { %v445_v60 = vadd.f32 1e-12, %v441_v59 }
 0x1b3   : > { %779 = vrsqrt.f32 %v445_v60 }
 0x1b9   : > { %v778_v62 = vpop.eup %777 }
 0x1ba   : > { %v448_v63 = vmul.f32 %v778_v62, %v442_v61 }
 0x1bc   : > { %v457_v4 = vmul.f32 %v666_v0, %v448_v63 }
 0x1bd   : > { %v780_v2 = vpop.eup %779 }
 0x1be   : > { %v449_v3 = vmul.f32 %v780_v2, %v443_v1  ;;  %v466_v7 = vadd.f32 %v667_v5, %v457_v4 }
 0x1c0   : > { %v458_v6 = vmul.f32 %v666_v0, %v449_v3 }
 0x1c2   : > { %v467_v8 = vadd.f32 %v667_v5, %v458_v6 }
 0x1c4   : > { %v468_v9 = vpack.c.bf16 %v467_v8, %v466_v7 }
 0x1c6   : > { %743 = vmatmul.mubr.bf16.vlgmr.msra.gmra.mrb[0].mxu1 %v468_v9 }
 0x299   : > { %v574_v11 = vpop.f32.mrb[0].mxu1 }
 0x29a   : > { %v744_v12 = vpop.f32.mrb[1].mxu1  ;;  %v575_v14 = vadd.f32 %v668_v10, %v574_v11 }
 0x29b   : > { %v577_v13 = vpop.f32.mrb[2].mxu1 }
 0x29c   : > { %v578_v15 = vadd.f32 %v668_v10, %v577_v13  ;;  %v745_v16 = vpop.f32.mrb[3].mxu1 }
 0x29e   : > { %v686_v17 = vpack.c.bf16 %v578_v15, %v575_v14 }
 0x2a0   : > { %687 = vst [vmem:[%s280_s9] sm:$0xff] %v686_v17  }
 0x2a1 PF: > { %s17_s24 = sadd.s32 1, %s787_s24  }
 0x2a2   : > { %p14_p4 = scmp.ge.s32.totalorder %s17_s24, 4  }
 0x2a4   :  { %16 = sbr.rel (!%p14_p4) target bundleno = 1 (0x1), region = 78 }

// kernel: bilstm_cnn_forward.1
= control target key start
LH: loop header
LB: loop body
LE: loop exit
PB: predicated region body
PF: predicated region fallthrough
CT: control target
= control target key end

     0   :  { %s831_s24 = smov 0   ;;  %s933_s0 = inlined_call_operand.vmem [shape: bf16[32,128], index: 0, kind: input, shape index: {}]   ;;  %s934_s1 = inlined_call_operand.vmem [shape: bf16[128,128], index: 1, kind: input, shape index: {}]   ;;  %s935_s2 = inlined_call_operand.vmem [shape: f32[1,128], index: 2, kind: input, shape index: {}]   ;;  %s936_s3 = inlined_call_operand.vmem [shape: f32[1,128], index: 3, kind: input, shape index: {}]   ;;  %s937_s4 = inlined_call_operand.vmem [shape: f32[1,128], index: 4, kind: input, shape index: {}]   ;;  %s938_s5 = inlined_call_operand.vmem [shape: bf16[128,128], index: 5, kind: input, shape index: {}]   ;;  %s939_s6 = inlined_call_operand.vmem [shape: f32[1,128], index: 6, kind: input, shape index: {}]   ;;  %s940_s7 = inlined_call_operand.vmem [shape: bf16[32,128], index: 7, kind: output, shape index: {}]  }
   0x1 LB: > { %s647_s25 = sadd.s32 4294967295, %s787_s24   ;;  %p651_p0 = scmp.ge.s32.totalorder %s787_s24, 1  ;;  %s787_s24 = sphi %s831_s24, %s17_s24  }
   0x2   : > { %p238_p1 = scmp.lt.s32.totalorder %s787_s24, 3 }
   0x4   : > { %p239_p2 = pnand %p651_p0, %p238_p1 }
   0x5   : > { %v756_v0 = vld [vmem:[%s934_s1] sm:$0xff] (!%p239_p2)   ;;  %v789_v1 = vmov (!%p239_p2), 0.0   ;;  %v757_v2 = vld [vmem:[%s934_s1 + $0x8] sm:$0xff] (!%p239_p2)   ;;  %vm790_vm0 = vmmov (!%p239_p2), 0   ;;  %s652_s30 = sshll.u32 (!%p239_p2), %s647_s25, 1  ;;  %v758_v3 = vld [vmem:[%s934_s1 + $0x10] sm:$0xff] (!%p239_p2)  }
   0x6   : > { %242 = sbr.rel (%p239_p2) target bundleno = 673 (0x2a1), region = 48  ;;  %706 = vmatprep.subr.bf16.mxu0 (!%p239_p2), %v789_v1  ;;  %726 = vmatprep.subr.bf16.mxu1 (!%p239_p2), %v789_v1  ;;  %p271_p3 = scmp.lt.s32.totalorder (!%p239_p2), %s652_s30, 3  ;;  %v759_v4 = vld [vmem:[%s934_s1 + $0x18] sm:$0xff] (!%p239_p2)   ;;  %v760_v5 = vld [vmem:[%s934_s1 + $0x20] sm:$0xff] (!%p239_p2)   ;;  %v761_v6 = vld [vmem:[%s934_s1 + $0x28] sm:$0xff] (!%p239_p2)  }
   0x7   : > { %707 = vmatpush3.bf16.msra.mxu0 (!%p239_p2), %v756_v0  ;;  %722 = vmatprep.mubr.msk.bf16.mxu0 (!%p239_p2), %vm790_vm0, %v789_v1  ;;  %v762_v7 = vld [vmem:[%s934_s1 + $0x30] sm:$0xff] (!%p239_p2)   ;;  %v763_v8 = vld [vmem:[%s934_s1 + $0x38] sm:$0xff] (!%p239_p2)   ;;  %v656_v10 = vld [vmem:[%s935_s2] ss:$0 sm:$0xff] (!%p239_p2) }
   0x8   : > { %708 = vmatprep.subr.bf16.mxu0 (!%p239_p2), %v789_v1  ;;  %742 = vmatprep.mubr.msk.bf16.mxu1 (!%p239_p2), %vm790_vm0, %v789_v1  ;;  %v765_v37 = vld [vmem:[%s938_s5] sm:$0xff] (!%p239_p2)   ;;  %v766_v38 = vld [vmem:[%s938_s5 + $0x8] sm:$0xff] (!%p239_p2)   ;;  %v767_v39 = vld [vmem:[%s938_s5 + $0x10] sm:$0xff] (!%p239_p2)  }
   0x9   : > { %727 = vmatpush3.bf16.msra.mxu1 (!%p239_p2), %v765_v37  ;;  %v768_v40 = vld [vmem:[%s938_s5 + $0x18] sm:$0xff] (!%p239_p2)   ;;  %v769_v41 = vld [vmem:[%s938_s5 + $0x20] sm:$0xff] (!%p239_p2)   ;;  %v770_v42 = vld [vmem:[%s938_s5 + $0x28] sm:$0xff] (!%p239_p2)  }
   0xa   : > { %728 = vmatprep.subr.bf16.mxu1 (!%p239_p2), %v789_v1  ;;  %v771_v43 = vld [vmem:[%s938_s5 + $0x30] sm:$0xff] (!%p239_p2)   ;;  %v772_v44 = vld [vmem:[%s938_s5 + $0x38] sm:$0xff] (!%p239_p2)   ;;  %v666_v0 = vld [vmem:[%s936_s3] ss:$0 sm:$0xff] (!%p239_p2) }
   0xb   : > { %709 = vmatpush3.bf16.msra.mxu0 (!%p239_p2), %v757_v2 }
   0xc   : > { %710 = vmatprep.subr.bf16.mxu0 (!%p239_p2), %v789_v1 }
   0xd   : > { %s942_s30 = smov (!%p271_p3, %s652_s30), 3  ;;  %729 = vmatpush3.bf16.msra.mxu1 %v766_v38 }
   0xe   : > { %s653_s10 = sshll.u32 %s942_s30, 2  ;;  %730 = vmatprep.subr.bf16.mxu1 %v789_v1 }
   0xf   : > { %s274_s13 = scalar_lea.vmem %s933_s0, %s653_s10  ;;  %711 = vmatpush3.bf16.msra.mxu0 %v758_v3  ;;  %s280_s9 = scalar_lea.vmem %s940_s7, %s653_s10 }
  0x10   : > { %712 = vmatprep.subr.bf16.mxu0 %v789_v1  ;;  %v764_v9 = vld [vmem:[%s274_s13] sm:$0xff]  }
  0x11   : > { %731 = vmatpush3.bf16.msra.mxu1 %v767_v39 }
  0x12   : > { %732 = vmatprep.subr.bf16.mxu1 %v789_v1 }
  0x13   : > { %713 = vmatpush3.bf16.msra.mxu0 %v759_v4 }
  0x14   : > { %714 = vmatprep.subr.bf16.mxu0 %v789_v1 }
  0x15   : > { %733 = vmatpush3.bf16.msra.mxu1 %v768_v40 }
  0x16   : > { %734 = vmatprep.subr.bf16.mxu1 %v789_v1 }
  0x17   : > { %715 = vmatpush3.bf16.msra.mxu0 %v760_v5  ;;  %v667_v5 = vld [vmem:[%s937_s4] ss:$0 sm:$0xff] }
  0x18   : > { %716 = vmatprep.subr.bf16.mxu0 %v789_v1 }
  0x19   : > { %735 = vmatpush3.bf16.msra.mxu1 %v769_v41 }
  0x1a   : > { %736 = vmatprep.subr.bf16.mxu1 %v789_v1 }
  0x1b   : > { %717 = vmatpush3.bf16.msra.mxu0 %v761_v6 }
  0x1c   : > { %718 = vmatprep.subr.bf16.mxu0 %v789_v1 }
  0x1d   : > { %737 = vmatpush3.bf16.msra.mxu1 %v770_v42 }
  0x1e   : > { %738 = vmatprep.subr.bf16.mxu1 %v789_v1 }
  0x1f   : > { %719 = vmatpush3.bf16.msra.mxu0 %v762_v7 }
  0x20   : > { %720 = vmatprep.subr.bf16.mxu0 %v789_v1 }
  0x21   : > { %739 = vmatpush3.bf16.msra.mxu1 %v771_v43 }
  0x22   : > { %740 = vmatprep.subr.bf16.mxu1 %v789_v1 }
  0x23   : > { %721 = vmatpush3.bf16.msra.mxu0 %v763_v8 }
  0x25   : > { %741 = vmatpush3.bf16.msra.mxu1 %v772_v44 }
  0x26   : > { %723 = vmatmul.mubr.bf16.vlgmr.msra.gmra.mrb[0].mxu0 %v764_v9 }
  0xf9   : > { %v396_v11 = vpop.f32.mrb[0].mxu0 }
  0xfa   : > { %v397_v12 = vadd.f32 %v656_v10, %v396_v11  ;;  %v724_v13 = vpop.f32.mrb[1].mxu0 }
  0xfb   : > { %v399_v14 = vpop.f32.mrb[2].mxu0 }
  0xfc   : > { %v403_v15 = vmul.f32 %v397_v12, %v397_v12  ;;  %v400_v16 = vadd.f32 %v656_v10, %v399_v14  ;;  %v725_v17 = vpop.f32.mrb[3].mxu0  ;;  %v668_v10 = vld [vmem:[%s939_s6] ss:$0 sm:$0xff] }
  0xfe   : > { %v405_v18 = vmul.f32 %v403_v15, %v397_v12  ;;  %v404_v19 = vmul.f32 %v400_v16, %v400_v16 }
 0x100   : > { %v407_v20 = vmul.f32 0.044715, %v405_v18  ;;  %v406_v21 = vmul.f32 %v404_v19, %v400_v16 }
 0x102   : > { %v409_v22 = vadd.f32 %v407_v20, %v397_v12  ;;  %v408_v23 = vmul.f32 0.044715, %v406_v21 }
 0x104   : > { %v411_v24 = vmul.f32 0.7978846, %v409_v22  ;;  %v410_v25 = vadd.f32 %v408_v23, %v400_v16 }
 0x106   : > { %v412_v26 = vmul.f32 0.7978846, %v410_v25  ;;  %773 = vtanh.f32 %v411_v24 }
 0x108   : > { %775 = vtanh.f32 %v412_v26 }
 0x110   : > { %v774_v27 = vpop.eup %773 }
 0x111   : > { %v415_v28 = vadd.f32 1.0, %v774_v27 }
 0x112   : > { %v776_v29 = vpop.eup %775 }
 0x113   : > { %v417_v30 = vmul.f32 0.5, %v415_v28  ;;  %v416_v31 = vadd.f32 1.0, %v776_v29 }
 0x115   : > { %v419_v32 = vmul.f32 %v417_v30, %v397_v12  ;;  %v418_v33 = vmul.f32 0.5, %v416_v31 }
 0x117   : > { %421 = vadd.xlane.f32.xlu0 %v419_v32  ;;  %v428_v34 = vmul.f32 %v419_v32, %v419_v32  ;;  %v420_v35 = vmul.f32 %v418_v33, %v400_v16 }
 0x119   : > { %430 = vadd.xlane.f32.xlu1 %v428_v34  ;;  %v429_v36 = vmul.f32 %v420_v35, %v420_v35 }
 0x11b   : > { %423 = vadd.xlane.f32.xlu0 %v420_v35 }
 0x11d   : > { %432 = vadd.xlane.f32.xlu1 %v429_v36 }
 0x1a4   : > { %v422_v45 = vpop.xlane.xlu0 %421 }
 0x1a5   : > { %v426_v46 = vmul.f32 0.0078125, %v422_v45 }
 0x1a6   : > { %v431_v47 = vpop.xlane.xlu1 %430 }
 0x1a7   : > { %v436_v48 = vmul.f32 %v426_v46, %v426_v46  ;;  %v434_v49 = vmul.f32 0.0078125, %v431_v47  ;;  %v442_v61 = vsub.f32 %v419_v32, %v426_v46 }
 0x1a8   : > { %v424_v50 = vpop.xlane.xlu0 %423 }
 0x1a9   : > { %v438_v51 = vsub.f32 %v434_v49, %v436_v48  ;;  %v427_v52 = vmul.f32 0.0078125, %v424_v50 }
 0x1aa   : > { %v433_v53 = vpop.xlane.xlu1 %432 }
 0x1ab   : > { %v440_v54 = vmax.f32 %v438_v51, 0.0  ;;  %v437_v55 = vmul.f32 %v427_v52, %v427_v52  ;;  %v435_v56 = vmul.f32 0.0078125, %v433_v53  ;;  %v443_v1 = vsub.f32 %v420_v35, %v427_v52 }
 0x1ad   : > { %v444_v57 = vadd.f32 1e-12, %v440_v54  ;;  %v439_v58 = vsub.f32 %v435_v56, %v437_v55 }
 0x1af   : > { %777 = vrsqrt.f32 %v444_v57  ;;  %v441_v59 = vmax.f32 %v439_v58, 0.0 }
 0x1b1   : > { %v445_v60 = vadd.f32 1e-12, %v441_v59 }
 0x1b3   : > { %779 = vrsqrt.f32 %v445_v60 }
 0x1b9   : > { %v778_v62 = vpop.eup %777 }
 0x1ba   : > { %v448_v63 = vmul.f32 %v778_v62, %v442_v61 }
 0x1bc   : > { %v457_v4 = vmul.f32 %v666_v0, %v448_v63 }
 0x1bd   : > { %v780_v2 = vpop.eup %779 }
 0x1be   : > { %v449_v3 = vmul.f32 %v780_v2, %v443_v1  ;;  %v466_v7 = vadd.f32 %v667_v5, %v457_v4 }
 0x1c0   : > { %v458_v6 = vmul.f32 %v666_v0, %v449_v3 }
 0x1c2   : > { %v467_v8 = vadd.f32 %v667_v5, %v458_v6 }
 0x1c4   : > { %v468_v9 = vpack.c.bf16 %v467_v8, %v466_v7 }
 0x1c6   : > { %743 = vmatmul.mubr.bf16.vlgmr.msra.gmra.mrb[0].mxu1 %v468_v9 }
 0x299   : > { %v574_v11 = vpop.f32.mrb[0].mxu1 }
 0x29a   : > { %v744_v12 = vpop.f32.mrb[1].mxu1  ;;  %v575_v14 = vadd.f32 %v668_v10, %v574_v11 }
 0x29b   : > { %v577_v13 = vpop.f32.mrb[2].mxu1 }
 0x29c   : > { %v578_v15 = vadd.f32 %v668_v10, %v577_v13  ;;  %v745_v16 = vpop.f32.mrb[3].mxu1 }
 0x29e   : > { %v686_v17 = vpack.c.bf16 %v578_v15, %v575_v14 }
 0x2a0   : > { %687 = vst [vmem:[%s280_s9] sm:$0xff] %v686_v17  }
 0x2a1 PF: > { %s17_s24 = sadd.s32 1, %s787_s24  }
 0x2a2   : > { %p14_p4 = scmp.ge.s32.totalorder %s17_s24, 4  }
 0x2a4   :  { %16 = sbr.rel (!%p14_p4) target bundleno = 1 (0x1), region = 78 }

</bundles_post_ra>
